<compile_context>
chip_gen: v7x
topology: tpu7x:2x2x1
jax: 0.10.0
libtpu: 0.0.40
codegen_flags: <defaults>
</compile_context>

<pallas_src>
import jax
import jax.numpy as jnp
from jax.experimental import pallas as pl
from jax.experimental.pallas import tpu as pltpu


def _identity_kernel(x_ref, o_ref):
    # Hot path: straight VMEM tile copy (wide vld -> wide vst).
    o_ref[...] = x_ref[...]


_PER_BLOCK_BYTES = 2 * 1024 * 1024   # ~2 MiB per block buffer (x4 pipelined ~= 8 MiB VMEM)
_LANE = 128


def _sublane_for(dtype):
    # Sub-32-bit dtypes pack along sublanes: 8 rows f32, 16 bf16, 32 int8/fp8.
    return {4: 8, 2: 16, 1: 32}.get(jnp.dtype(dtype).itemsize, 8)


def receiver_forward(x, _input=None, _aux_input=None):
    """Pallas equivalent of Receiver.forward: returns x unchanged."""
    orig_shape = x.shape

    # Flatten to 2-D [M, N]; for contiguous arrays this is metadata-only.
    if x.ndim == 0:
        x2 = x.reshape(1, 1)
    elif x.ndim == 1:
        x2 = x.reshape(1, -1)
    else:
        x2 = x.reshape(-1, x.shape[-1])
    M, N = x2.shape

    itemsize = x2.dtype.itemsize
    sublane = _sublane_for(x2.dtype)

    # Lane (last) dim: lane-dense, up to 2048 lanes when 128-aligned,
    # otherwise the full axis (full-extent block dims are always legal).
    if N % _LANE == 0:
        tile_n = min(N, 16 * _LANE)
    else:
        tile_n = N

    # Sublane dim: fill the per-block budget with whole sublane groups.
    row_bytes = max(1, tile_n * itemsize)
    rows = max(sublane, (_PER_BLOCK_BYTES // row_bytes) // sublane * sublane)
    tile_m = M if M <= rows else rows

    grid = (pl.cdiv(M, tile_m), pl.cdiv(N, tile_n))

    out = pl.pallas_call(
        _identity_kernel,
        out_shape=jax.ShapeDtypeStruct((M, N), x2.dtype),
        grid=grid,
        in_specs=[pl.BlockSpec((tile_m, tile_n), lambda i, j: (i, j))],
        out_specs=pl.BlockSpec((tile_m, tile_n), lambda i, j: (i, j)),
        input_output_aliases={0: 0},  # output aliases input HBM buffer
        compiler_params=pltpu.CompilerParams(
            dimension_semantics=("parallel", "parallel"),
            vmem_limit_bytes=32 << 20,
        ),
    )(x2)

    # dtype is unchanged by construction; reshape back is metadata-only.
    return out.reshape(orig_shape)


if __name__ == "__main__":
    key = jax.random.PRNGKey(0)
    shape = (2, 4, 16, 16)
    x = jax.random.normal(key, shape, dtype=jnp.float32)
    # Reference regenerated from the same key: an independent buffer so the
    # check does not depend on x's buffer after potential donation/aliasing.
    expected = jax.random.normal(key, shape, dtype=jnp.float32)

    y = receiver_forward(x)
    y = jax.block_until_ready(y)

    assert y.shape == expected.shape and y.dtype == expected.dtype
    assert bool(jnp.array_equal(y, expected))
    print("KERNEL_OK")
</pallas_src>

<mosaic_0001>
module attributes {stable_mosaic.version = 11 : i64} {
  func.func @_identity_kernel(%arg0: i32, %arg1: i32, %arg2: memref<128x16xf32, #tpu.memory_space<vmem>>, %arg3: memref<128x16xf32, #tpu.memory_space<vmem>>) attributes {dimension_semantics = [#tpu.dimension_semantics<parallel>, #tpu.dimension_semantics<parallel>], iteration_bounds = array<i64: 1, 1>, scalar_prefetch = 0 : i64, scratch_operands = 0 : i64, tpu.core_type = #tpu.core_type<tc>, window_params = [{transform_indices = @transform_0, window_bounds = array<i64: 128, 16>}, {transform_indices = @transform_1, window_bounds = array<i64: 128, 16>}]} {
    %c0 = arith.constant 0 : index
    %c0_0 = arith.constant 0 : index
    %0 = vector.load %arg2[%c0, %c0_0] : memref<128x16xf32, #tpu.memory_space<vmem>>, vector<128x16xf32>
    %c0_1 = arith.constant 0 : index
    %c0_2 = arith.constant 0 : index
    %1 = vector.load %arg3[%c0_1, %c0_2] : memref<128x16xf32, #tpu.memory_space<vmem>>, vector<128x16xf32>
    tpu.vector_store %arg3[%c0_1, %c0_2], %0 {strides = array<i32>} : memref<128x16xf32, #tpu.memory_space<vmem>>, vector<128x16xf32>,
    return
  }
  func.func @transform_0(%arg0: i32, %arg1: i32) -> (i32, i32) {
    %c0_i32 = arith.constant 0 : i32
    return %arg0, %arg1 : i32, i32
  }
  func.func @transform_1(%arg0: i32, %arg1: i32) -> (i32, i32) {
    %c0_i32 = arith.constant 0 : i32
    return %arg0, %arg1 : i32, i32
  }
}

</mosaic_0001>

<bundles_post_ra>
// kernel: tpu_custom_call.1
= control target key start
LH: loop header
LB: loop body
LE: loop exit
PB: predicated region body
PF: predicated region fallthrough
CT: control target
= control target key end

     0   :  { %vm24_vm0 = vcmask 130048   ;;  %s167_s0 = inlined_call_operand.vmem [shape: f32[128,16], index: 0, kind: input, shape index: {}, may-alias: {0,1}]   ;;  %s168_s1 = inlined_call_operand.vmem [shape: f32[128,16], index: 1, kind: output, shape index: {}, may-alias: {0,1}]  }
   0x1   :  { %v8_v0 = vld [vmem:[%s167_s0] sm:$0xff]  ;;  %v9_v1 = vld [vmem:[%s167_s0 + $0x8] sm:$0xff]  ;;  %v10_v2 = vld [vmem:[%s167_s0 + $0x10] sm:$0xff] }
   0x2   :  { %25 = vst.msk [vmem:[%s168_s1] sm:$0xff] %vm24_vm0, %v8_v0  ;;  %26 = vst.msk [vmem:[%s168_s1 + $0x8] sm:$0xff] %vm24_vm0, %v9_v1 }
   0x3   :  { %27 = vst.msk [vmem:[%s168_s1 + $0x10] sm:$0xff] %vm24_vm0, %v10_v2 }
   0xa   :  { %v11_v3 = vld [vmem:[%s167_s0 + $0x18] sm:$0xff]  ;;  %v12_v4 = vld [vmem:[%s167_s0 + $0x20] sm:$0xff]  ;;  %v13_v5 = vld [vmem:[%s167_s0 + $0x28] sm:$0xff] }
   0xb   :  { %28 = vst.msk [vmem:[%s168_s1 + $0x18] sm:$0xff] %vm24_vm0, %v11_v3  ;;  %29 = vst.msk [vmem:[%s168_s1 + $0x20] sm:$0xff] %vm24_vm0, %v12_v4 }
   0xc   :  { %30 = vst.msk [vmem:[%s168_s1 + $0x28] sm:$0xff] %vm24_vm0, %v13_v5 }
  0x13   :  { %v14_v6 = vld [vmem:[%s167_s0 + $0x30] sm:$0xff]  ;;  %v15_v7 = vld [vmem:[%s167_s0 + $0x38] sm:$0xff]  ;;  %v16_v8 = vld [vmem:[%s167_s0 + $0x40] sm:$0xff] }
  0x14   :  { %31 = vst.msk [vmem:[%s168_s1 + $0x30] sm:$0xff] %vm24_vm0, %v14_v6  ;;  %32 = vst.msk [vmem:[%s168_s1 + $0x38] sm:$0xff] %vm24_vm0, %v15_v7 }
  0x15   :  { %33 = vst.msk [vmem:[%s168_s1 + $0x40] sm:$0xff] %vm24_vm0, %v16_v8 }
  0x1c   :  { %v17_v9 = vld [vmem:[%s167_s0 + $0x48] sm:$0xff]  ;;  %v18_v10 = vld [vmem:[%s167_s0 + $0x50] sm:$0xff]  ;;  %v19_v11 = vld [vmem:[%s167_s0 + $0x58] sm:$0xff] }
  0x1d   :  { %34 = vst.msk [vmem:[%s168_s1 + $0x48] sm:$0xff] %vm24_vm0, %v17_v9  ;;  %35 = vst.msk [vmem:[%s168_s1 + $0x50] sm:$0xff] %vm24_vm0, %v18_v10 }
  0x1e   :  { %36 = vst.msk [vmem:[%s168_s1 + $0x58] sm:$0xff] %vm24_vm0, %v19_v11 }
  0x25   :  { %v20_v12 = vld [vmem:[%s167_s0 + $0x60] sm:$0xff]  ;;  %v21_v13 = vld [vmem:[%s167_s0 + $0x68] sm:$0xff]  ;;  %v22_v14 = vld [vmem:[%s167_s0 + $0x70] sm:$0xff] }
  0x26   :  { %37 = vst.msk [vmem:[%s168_s1 + $0x60] sm:$0xff] %vm24_vm0, %v20_v12  ;;  %38 = vst.msk [vmem:[%s168_s1 + $0x68] sm:$0xff] %vm24_vm0, %v21_v13 }
  0x27   :  { %39 = vst.msk [vmem:[%s168_s1 + $0x70] sm:$0xff] %vm24_vm0, %v22_v14 }
  0x2e   :  { %v23_v15 = vld [vmem:[%s167_s0 + $0x78] sm:$0xff] }
  0x2f   :  { %40 = vst.msk [vmem:[%s168_s1 + $0x78] sm:$0xff] %vm24_vm0, %v23_v15 }

</bundles_post_ra>
